<compile_context>
chip_gen: v7x
topology: tpu7x:2x2x1
jax: 0.10.0
libtpu: 0.0.40
codegen_flags: <defaults>
</compile_context>

<pallas_src>
import functools

import jax
import jax.numpy as jnp
from jax import lax
from jax.experimental import pallas as pl
from jax.experimental.pallas import tpu as pltpu


def positions_attention_mlp_kernel(
    pos_ref, nmask_ref, dlhs_ref, drhs_ref, pslab_ref, sc_ref, out_ref, *, eps):
    """TB batch elements per grid step; all tensors lane-dense (node axis last)."""
    f32 = jnp.float32
    bf16 = jnp.bfloat16

    pos_t = pos_ref[...]        # (TB, 3, N)
    nmask = nmask_ref[...]      # (TB, 1, N)
    dlhs = dlhs_ref[...]        # (TB, 8, N) pre-stacked masked-distance operand (wrapper)
    drhs = drhs_ref[...]        # (TB, 8, N)
    ps = pslab_ref[...]         # (H, 8) packed / pre-folded params (see wrapper)
    bc = sc_ref[0]              # combined_score bias (scalar, SMEM)
    b2 = sc_ref[1]              # lin_2 bias (scalar, SMEM)
    n = pos_t.shape[2]

    w1 = ps[:, 0:1]; b1 = ps[:, 1:2]                        # (H, 1)
    wpx = ps[:, 2:3]; wpy = ps[:, 3:4]; wpz = ps[:, 4:5]    # wc_pos * wp rows
    bpc = ps[:, 5:6]                                        # wc_pos * bp + bd*wc_dist
    av = ps[:, 6:7]                                         # wd * wc_dist
    w2 = ps[:, 7:8]

    px = pos_t[:, 0:1, :]; py = pos_t[:, 1:2, :]; pz = pos_t[:, 2:3, :]   # (TB, 1, N)

    # norm + lin_1: pure VPU broadcasts (no MXU, no lane reduction)
    norm = jnp.sqrt(px * px + py * py + pz * pz)            # (TB, 1, N)
    hidden = norm * w1 + b1                                 # (TB, H, N)

    # attention RHS: wc_pos * (pos @ wp + bp) + bd*wc_dist   ("+c_i" folds into the matmul)
    rhs = px * wpx + py * wpy + pz * wpz + bpc              # (TB, H, N)
    # score_pc[b, j, i] = <hidden_i, wc_pos * pos_proj_j> + c_i
    # bf16 operands, f32 accumulate (K=H only -> MXU is never the binding unit; do not
    # chase MXU utilization further, per review).
    score_pc = jnp.einsum('bhj,bhi->bji', rhs.astype(bf16), hidden.astype(bf16),
                          preferred_element_type=f32)       # (TB, N, N)

    # masked pairwise distances: one aligned K=8 f32 matmul, operands pre-stacked in the
    # wrapper (no in-kernel concatenate).  d2m[x,y] = m_x*m_y*||p_x - p_y||^2.
    d2m = jnp.einsum('bkx,bky->bxy', dlhs, drhs,
                     preferred_element_type=f32)            # (TB, N, N)
    row = lax.broadcasted_iota(jnp.int32, (n, n), 0)
    col = lax.broadcasted_iota(jnp.int32, (n, n), 1)
    dists = jnp.where((row != col)[None, :, :],
                      jnp.sqrt(jnp.maximum(d2m, 0.0)), 0.0)

    # distance-branch slope a_i = <hidden_i, wd*wc_dist>    (small sublane reduce -> XLU)
    a = jnp.sum(hidden * av, axis=1, keepdims=True)         # (TB, 1, N)

    # scores_T[b, j, i]; softmax over j (keys) = axis 1
    # TODO(synk): flash-style tiling over j (online softmax with m/l/acc scratch) once
    # 6*TB*N^2*4B exceeds the VMEM budget even at TB=1 (N >~ 1300); the wrapper already
    # shrinks TB for large N below that point.
    scores = score_pc + dists * a + bc                      # (TB, N, N) f32
    m = jnp.max(scores, axis=1, keepdims=True)
    e = jnp.exp(scores - m)                                 # f32 EUP (bf16-exp left as a
    # TODO(synk): bf16 exp on v6e/v7x once the EUP becomes the binding slot at large N.
    inv_den = pl.reciprocal(jnp.sum(e, axis=1, keepdims=True), approx=True)
    attn = (e * inv_den).astype(bf16)                       # bf16 for the context matmul

    # context_T = pos_T @ attn_T -> lane-dense (3, N) result  (bf16 MXU, f32 accumulate)
    context = jnp.einsum('bdj,bji->bdi', pos_t.astype(bf16), attn,
                         preferred_element_type=f32)        # (TB, 3, N)

    # lin_2: ReLU -> Linear(H, 1)                            (sublane reduce)
    new_norm = jnp.sum(jnp.maximum(hidden, 0.0) * w2, axis=1, keepdims=True) + b2

    new_pos = pos_t * new_norm * context * pl.reciprocal(norm + eps, approx=True)
    new_pos = new_pos * nmask
    new_pos = new_pos - jnp.mean(new_pos, axis=2, keepdims=True)         # center over nodes
    # TODO(synk): lane-dense flat (3, TB*N) store for N < 128 (removes vst.msk tails)
    # once the sublane->lane merge relayout is verified on the target Mosaic version.
    out_ref[...] = new_pos                                   # lane-dense (TB, 3, N) store


def _choose_tb_and_vmem(B, N, H, batch_block=None):
    """Adaptive batch tile + explicit VMEM limit (review items: adaptive TB, v7x grid>=4,
    explicit vmem_limit_bytes budgeted against the (TB,N,N) live set)."""
    # f32 live-set estimate per batch element: ~6 (N,N) temporaries, ~3 (H,N) slabs
    # (+ bf16 copies), double-buffered IO rows (3+1+8+8+3 = 23 sublane rows of N lanes).
    per_b = 4 * (6 * N * N + 4 * H * N + 2 * 23 * N) + 4096
    budget = 40 << 20                      # headroom below v7x's 64 MiB physical VMEM
    tb_vmem = max(1, budget // max(per_b, 1))
    tb_grid = max(1, B // 4)               # >= 4 grid steps -> >= 2 pipelined steps / v7x TC
    cap = batch_block if batch_block is not None else B
    tb = int(max(1, min(cap, tb_vmem, tb_grid, B)))
    vmem_limit = int(min(56 << 20, max(32 << 20, 2 * tb * per_b + (4 << 20))))
    return tb, vmem_limit


def positions_attention_mlp(pos, node_mask, p, pharma_mask, params, eps=1e-5,
                            batch_block=None):
    B, N, _ = pos.shape
    H = params["w1"].shape[1]
    f32 = jnp.float32

    # lane-dense layouts: coordinates (B, 3, N), masks (B, 1, N)
    pos_t = jnp.swapaxes(pos.astype(f32), 1, 2)
    p_t = jnp.swapaxes(p.astype(f32), 1, 2)
    nmask = node_mask.reshape(B, 1, N).astype(f32)
    pmask = pharma_mask.reshape(B, 1, N).astype(f32)

    # Pre-stacked K=8 operands for the masked pairwise-distance matmul (replaces two
    # in-kernel sublane concatenations); pmask folded into both sides (binary mask).
    p_m = p_t * pmask                                                    # (B, 3, N)
    psq_m = jnp.sum(p_t * p_t, axis=1, keepdims=True) * pmask            # (B, 1, N)
    zpad = jnp.zeros((B, 3, N), f32)
    dlhs = jnp.concatenate([-2.0 * p_m, psq_m, pmask, zpad], axis=1)     # (B, 8, N)
    drhs = jnp.concatenate([p_m, pmask, psq_m, zpad], axis=1)            # (B, 8, N)

    # Fold batch-independent parameter products once and pack into one (H, 8) VMEM slab.
    w1 = params["w1"][0]; b1 = params["b1"][0]
    wp = params["wp"]; bp_row = params["bp"][0]
    wc_pos = params["wc"][0]; wc_dist = params["wc"][1]
    av = params["wd"][0] * wc_dist          # distance-branch slope vector
    cv = params["bd"][0] * wc_dist          # distance-branch intercept (folds into RHS)
    w2 = params["w2"][:, 0]
    pslab = jnp.stack(
        [w1, b1, wp[0] * wc_pos, wp[1] * wc_pos, wp[2] * wc_pos,
         bp_row * wc_pos + cv, av, w2], axis=1).astype(f32)              # (H, 8)
    scalars = jnp.array([params["bc"][0, 0], params["b2"][0, 0]], f32)   # SMEM: [bc, b2]

    tb, vmem_limit = _choose_tb_and_vmem(B, N, H, batch_block)
    b_pad = ((B + tb - 1) // tb) * tb
    if b_pad != B:
        pad = ((0, b_pad - B), (0, 0), (0, 0))
        pos_t, nmask = jnp.pad(pos_t, pad), jnp.pad(nmask, pad)
        dlhs, drhs = jnp.pad(dlhs, pad), jnp.pad(drhs, pad)

    bmap = lambda b: (b, 0, 0)
    kernel = functools.partial(positions_attention_mlp_kernel, eps=eps)
    out_t = pl.pallas_call(
        kernel,
        out_shape=jax.ShapeDtypeStruct((b_pad, 3, N), f32),
        grid_spec=pltpu.PrefetchScalarGridSpec(
            num_scalar_prefetch=0,
            grid=(b_pad // tb,),
            in_specs=[
                pl.BlockSpec((tb, 3, N), bmap),                          # pos (B, 3, N)
                pl.BlockSpec((tb, 1, N), bmap),                          # node_mask
                pl.BlockSpec((tb, 8, N), bmap),                          # distance lhs
                pl.BlockSpec((tb, 8, N), bmap),                          # distance rhs
                pl.BlockSpec((H, 8), lambda b: (0, 0)),                  # packed params
                pl.BlockSpec(memory_space=pltpu.MemorySpace.SMEM),       # [bc, b2] scalars
            ],
            out_specs=pl.BlockSpec((tb, 3, N), bmap),
        ),
        compiler_params=pltpu.CompilerParams(
            dimension_semantics=("parallel",),
            vmem_limit_bytes=vmem_limit),
    )(pos_t, nmask, dlhs, drhs, pslab, scalars)
    return jnp.swapaxes(out_t[:B], 1, 2)                                 # (B, N, 3)


def reference(pos, node_mask, p, pharma_mask, params, eps=1e-5):
    """Pure-JAX f32 reference of the same (intended) forward semantics."""
    B, N, _ = pos.shape
    nmask = node_mask.reshape(B, N, 1).astype(jnp.float32)
    pmask = pharma_mask.reshape(B, N, 1).astype(jnp.float32)

    norm = jnp.sqrt(jnp.sum(pos * pos, -1, keepdims=True))
    hidden = norm @ params["w1"] + params["b1"]
    eye = jnp.eye(N, dtype=jnp.float32)
    edge = (1.0 - eye)[None] * (pmask @ jnp.swapaxes(pmask, -1, -2))
    p_sq = jnp.sum(p * p, -1, keepdims=True)
    d2 = p_sq + jnp.swapaxes(p_sq, -1, -2) - 2.0 * jnp.einsum("bik,bjk->bij", p, p)
    dists = jnp.sqrt(jnp.maximum(d2, 0.0)) * edge
    pos_proj = pos @ params["wp"] + params["bp"]
    wc_pos, wc_dist = params["wc"][0:1], params["wc"][1:2]
    score_pos = jnp.einsum("bih,bjh->bij", hidden * wc_pos, pos_proj)
    a = jnp.einsum("bih,h->bi", hidden, (params["wd"] * wc_dist)[0])[..., None]
    c = jnp.einsum("bih,h->bi", hidden, (params["bd"] * wc_dist)[0])[..., None]
    scores = score_pos + dists * a + c + params["bc"][0, 0]
    attn = jax.nn.softmax(scores, axis=-1)
    context = jnp.einsum("bij,bjk->bik", attn, pos)
    new_norm = jnp.maximum(hidden, 0.0) @ params["w2"] + params["b2"]
    new_pos = pos * new_norm * context / (norm + eps)
    new_pos = new_pos * nmask
    return new_pos - jnp.mean(new_pos, axis=1, keepdims=True)


if __name__ == "__main__":
    B, N, H = 8, 8, 32
    key = jax.random.PRNGKey(0)
    keys = jax.random.split(key, 12)

    def init(k, shape, fan_in):
        bound = 1.0 / (fan_in ** 0.5)
        return jax.random.uniform(k, shape, jnp.float32, -bound, bound)

    params = {
        "w1": init(keys[0], (1, H), 1),      "b1": init(keys[1], (1, H), 1),
        "wp": init(keys[2], (3, H), 3),      "bp": init(keys[3], (1, H), 3),
        "wd": init(keys[4], (1, H), 1),      "bd": init(keys[5], (1, H), 1),
        # combined_score Linear(2H,1) weight reshaped to (2, H): row 0 -> position
        # branch features, row 1 -> distance branch features.
        "wc": init(keys[6], (2, H), 2 * H),  "bc": init(keys[7], (1, 1), 2 * H),
        "w2": init(keys[8], (H, 1), H),      "b2": init(keys[9], (1, 1), H),
    }

    pos = jax.random.normal(keys[10], (B, N, 3), jnp.float32)
    p = jax.random.normal(keys[11], (B, N, 3), jnp.float32)
    node_mask = jnp.ones((B, N), jnp.float32).at[:, -2:].set(0.0)
    pharma_mask = jnp.ones((B, N), jnp.float32).at[:, -3:].set(0.0)

    out = positions_attention_mlp(pos, node_mask, p, pharma_mask, params)
    out = jax.block_until_ready(out)

    ref = reference(pos, node_mask, p, pharma_mask, params)
    err = float(jnp.max(jnp.abs(out - ref)))
    # Tolerance reflects the bf16 MXU operands (score/context matmuls) and the two
    # approx-reciprocals vs the pure-f32 reference; observed error is O(1e-3) here.
    if not (err < 5e-2):
        raise SystemExit(f"mismatch vs reference, max abs err = {err}")
    print("KERNEL_OK")
</pallas_src>

<mosaic_0001>
module attributes {stable_mosaic.version = 11 : i64} {
  func.func @positions_attention_mlp_kernel(%arg0: i32, %arg1: memref<2x3x8xf32, #tpu.memory_space<vmem>>, %arg2: memref<2x1x8xf32, #tpu.memory_space<vmem>>, %arg3: memref<2x8x8xf32, #tpu.memory_space<vmem>>, %arg4: memref<2x8x8xf32, #tpu.memory_space<vmem>>, %arg5: memref<32x8xf32, #tpu.memory_space<vmem>>, %arg6: memref<2xf32, #tpu.memory_space<smem>>, %arg7: memref<2x3x8xf32, #tpu.memory_space<vmem>>) attributes {dimension_semantics = [#tpu.dimension_semantics<parallel>], iteration_bounds = array<i64: 4>, scalar_prefetch = 0 : i64, scratch_operands = 0 : i64, tpu.core_type = #tpu.core_type<tc>, window_params = [{transform_indices = @transform_0, window_bounds = array<i64: 2, 3, 8>}, {transform_indices = @transform_1, window_bounds = array<i64: 2, 1, 8>}, {transform_indices = @transform_2, window_bounds = array<i64: 2, 8, 8>}, {transform_indices = @transform_3, window_bounds = array<i64: 2, 8, 8>}, {pipeline_mode = #tpu.pipeline_mode<synchronous>, transform_indices = @transform_4, window_bounds = array<i64: 32, 8>}, {transform_indices = @transform_5, window_bounds = array<i64: 2>}, {transform_indices = @transform_6, window_bounds = array<i64: 2, 3, 8>}]} {
    %c0 = arith.constant 0 : index
    %c0_0 = arith.constant 0 : index
    %c0_1 = arith.constant 0 : index
    %0 = vector.load %arg1[%c0, %c0_0, %c0_1] : memref<2x3x8xf32, #tpu.memory_space<vmem>>, vector<2x3x8xf32>
    %c0_2 = arith.constant 0 : index
    %c0_3 = arith.constant 0 : index
    %c0_4 = arith.constant 0 : index
    %1 = vector.load %arg2[%c0_2, %c0_3, %c0_4] : memref<2x1x8xf32, #tpu.memory_space<vmem>>, vector<2x1x8xf32>
    %c0_5 = arith.constant 0 : index
    %c0_6 = arith.constant 0 : index
    %c0_7 = arith.constant 0 : index
    %2 = vector.load %arg3[%c0_5, %c0_6, %c0_7] : memref<2x8x8xf32, #tpu.memory_space<vmem>>, vector<2x8x8xf32>
    %c0_8 = arith.constant 0 : index
    %c0_9 = arith.constant 0 : index
    %c0_10 = arith.constant 0 : index
    %3 = vector.load %arg4[%c0_8, %c0_9, %c0_10] : memref<2x8x8xf32, #tpu.memory_space<vmem>>, vector<2x8x8xf32>
    %c0_11 = arith.constant 0 : index
    %c0_12 = arith.constant 0 : index
    %4 = vector.load %arg5[%c0_11, %c0_12] : memref<32x8xf32, #tpu.memory_space<vmem>>, vector<32x8xf32>
    %c0_13 = arith.constant 0 : index
    %5 = memref.load %arg6[%c0_13] : memref<2xf32, #tpu.memory_space<smem>>
    %c1 = arith.constant 1 : index
    %6 = memref.load %arg6[%c1] : memref<2xf32, #tpu.memory_space<smem>>
    %7 = vector.extract_strided_slice %4 {offsets = [0, 0], sizes = [32, 1], strides = [1, 1]} : vector<32x8xf32> to vector<32x1xf32>
    %8 = vector.extract_strided_slice %4 {offsets = [0, 1], sizes = [32, 1], strides = [1, 1]} : vector<32x8xf32> to vector<32x1xf32>
    %9 = vector.extract_strided_slice %4 {offsets = [0, 2], sizes = [32, 1], strides = [1, 1]} : vector<32x8xf32> to vector<32x1xf32>
    %10 = vector.extract_strided_slice %4 {offsets = [0, 3], sizes = [32, 1], strides = [1, 1]} : vector<32x8xf32> to vector<32x1xf32>
    %11 = vector.extract_strided_slice %4 {offsets = [0, 4], sizes = [32, 1], strides = [1, 1]} : vector<32x8xf32> to vector<32x1xf32>
    %12 = vector.extract_strided_slice %4 {offsets = [0, 5], sizes = [32, 1], strides = [1, 1]} : vector<32x8xf32> to vector<32x1xf32>
    %13 = vector.extract_strided_slice %4 {offsets = [0, 6], sizes = [32, 1], strides = [1, 1]} : vector<32x8xf32> to vector<32x1xf32>
    %14 = vector.extract_strided_slice %4 {offsets = [0, 7], sizes = [32, 1], strides = [1, 1]} : vector<32x8xf32> to vector<32x1xf32>
    %15 = vector.extract_strided_slice %0 {offsets = [0, 0, 0], sizes = [2, 1, 8], strides = [1, 1, 1]} : vector<2x3x8xf32> to vector<2x1x8xf32>
    %16 = vector.extract_strided_slice %0 {offsets = [0, 1, 0], sizes = [2, 1, 8], strides = [1, 1, 1]} : vector<2x3x8xf32> to vector<2x1x8xf32>
    %17 = vector.extract_strided_slice %0 {offsets = [0, 2, 0], sizes = [2, 1, 8], strides = [1, 1, 1]} : vector<2x3x8xf32> to vector<2x1x8xf32>
    %18 = arith.mulf %15, %15 : vector<2x1x8xf32>
    %19 = arith.mulf %16, %16 : vector<2x1x8xf32>
    %20 = arith.addf %18, %19 : vector<2x1x8xf32>
    %21 = arith.mulf %17, %17 : vector<2x1x8xf32>
    %22 = arith.addf %20, %21 : vector<2x1x8xf32>
    %23 = math.sqrt %22 : vector<2x1x8xf32>
    %24 = vector.shape_cast %7 : vector<32x1xf32> to vector<1x32x1xf32>
    %25 = vector.broadcast %23 : vector<2x1x8xf32> to vector<2x32x8xf32>
    %26 = vector.broadcast %24 : vector<1x32x1xf32> to vector<2x32x8xf32>
    %27 = arith.mulf %25, %26 : vector<2x32x8xf32>
    %28 = vector.shape_cast %8 : vector<32x1xf32> to vector<1x32x1xf32>
    %29 = vector.broadcast %28 : vector<1x32x1xf32> to vector<2x32x8xf32>
    %30 = arith.addf %27, %29 : vector<2x32x8xf32>
    %31 = vector.shape_cast %9 : vector<32x1xf32> to vector<1x32x1xf32>
    %32 = vector.broadcast %15 : vector<2x1x8xf32> to vector<2x32x8xf32>
    %33 = vector.broadcast %31 : vector<1x32x1xf32> to vector<2x32x8xf32>
    %34 = arith.mulf %32, %33 : vector<2x32x8xf32>
    %35 = vector.shape_cast %10 : vector<32x1xf32> to vector<1x32x1xf32>
    %36 = vector.broadcast %16 : vector<2x1x8xf32> to vector<2x32x8xf32>
    %37 = vector.broadcast %35 : vector<1x32x1xf32> to vector<2x32x8xf32>
    %38 = arith.mulf %36, %37 : vector<2x32x8xf32>
    %39 = arith.addf %34, %38 : vector<2x32x8xf32>
    %40 = vector.shape_cast %11 : vector<32x1xf32> to vector<1x32x1xf32>
    %41 = vector.broadcast %17 : vector<2x1x8xf32> to vector<2x32x8xf32>
    %42 = vector.broadcast %40 : vector<1x32x1xf32> to vector<2x32x8xf32>
    %43 = arith.mulf %41, %42 : vector<2x32x8xf32>
    %44 = arith.addf %39, %43 : vector<2x32x8xf32>
    %45 = vector.shape_cast %12 : vector<32x1xf32> to vector<1x32x1xf32>
    %46 = vector.broadcast %45 : vector<1x32x1xf32> to vector<2x32x8xf32>
    %47 = arith.addf %44, %46 : vector<2x32x8xf32>
    %48 = arith.truncf %47 : vector<2x32x8xf32> to vector<2x32x8xbf16>
    %49 = arith.truncf %30 : vector<2x32x8xf32> to vector<2x32x8xbf16>
    "tpu.trace_start"() <{level = 10 : i32, message = "bhj,bhi->bji"}> : () -> ()
    %cst = arith.constant dense<0.000000e+00> : vector<2x8x8xf32>
    %50 = tpu.matmul %48, %49, %cst {dimension_numbers = #tpu.dot_dimension_numbers<[1], [1], [2], [2], [0, 0, 0, 2, 1, 2], [0], [0]>} : vector<2x32x8xbf16>, vector<2x32x8xbf16>, vector<2x8x8xf32> -> vector<2x8x8xf32>
    "tpu.trace_stop"() : () -> ()
    "tpu.trace_start"() <{level = 10 : i32, message = "bkx,bky->bxy"}> : () -> ()
    %cst_14 = arith.constant dense<0.000000e+00> : vector<2x8x8xf32>
    %51 = tpu.matmul %2, %3, %cst_14 {dimension_numbers = #tpu.dot_dimension_numbers<[1], [1], [2], [2], [0, 0, 0, 2, 1, 2], [0], [0]>} : vector<2x8x8xf32>, vector<2x8x8xf32>, vector<2x8x8xf32> -> vector<2x8x8xf32>
    "tpu.trace_stop"() : () -> ()
    %52 = tpu.iota {dimensions = array<i32: 0>} : vector<8x8xi32>
    %53 = tpu.iota {dimensions = array<i32: 1>} : vector<8x8xi32>
    %54 = arith.cmpi ne, %52, %53 : vector<8x8xi32>
    %55 = vector.shape_cast %54 : vector<8x8xi1> to vector<1x8x8xi1>
    %cst_15 = arith.constant 0.000000e+00 : f32
    %56 = vector.broadcast %cst_15 : f32 to vector<2x8x8xf32>
    %57 = arith.maximumf %51, %56 : vector<2x8x8xf32>
    %58 = math.sqrt %57 : vector<2x8x8xf32>
    %cst_16 = arith.constant 0.000000e+00 : f32
    %59 = vector.shape_cast %55 : vector<1x8x8xi1> to vector<1x8x8xi1>
    %60 = vector.broadcast %59 : vector<1x8x8xi1> to vector<2x8x8xi1>
    %61 = vector.broadcast %cst_16 : f32 to vector<2x8x8xf32>
    %62 = arith.select %60, %58, %61 : vector<2x8x8xi1>, vector<2x8x8xf32>
    %63 = vector.shape_cast %13 : vector<32x1xf32> to vector<1x32x1xf32>
    %64 = vector.broadcast %63 : vector<1x32x1xf32> to vector<2x32x8xf32>
    %65 = arith.mulf %30, %64 : vector<2x32x8xf32>
    %cst_17 = arith.constant dense<0.000000e+00> : vector<2x8xf32>
    %66 = vector.multi_reduction <add>, %65, %cst_17 [1] : vector<2x32x8xf32> to vector<2x8xf32>
    %67 = vector.shape_cast %66 : vector<2x8xf32> to vector<2x1x8xf32>
    %68 = vector.broadcast %67 : vector<2x1x8xf32> to vector<2x8x8xf32>
    %69 = arith.mulf %62, %68 : vector<2x8x8xf32>
    %70 = arith.addf %50, %69 : vector<2x8x8xf32>
    %71 = vector.broadcast %5 : f32 to vector<2x8x8xf32>
    %72 = arith.addf %70, %71 : vector<2x8x8xf32>
    %cst_18 = arith.constant dense<0xFF800000> : vector<2x8xf32>
    %73 = vector.multi_reduction <maximumf>, %72, %cst_18 [1] : vector<2x8x8xf32> to vector<2x8xf32>
    %74 = vector.shape_cast %73 : vector<2x8xf32> to vector<2x1x8xf32>
    %75 = vector.broadcast %74 : vector<2x1x8xf32> to vector<2x8x8xf32>
    %76 = arith.subf %72, %75 : vector<2x8x8xf32>
    %77 = math.exp %76 : vector<2x8x8xf32>
    %cst_19 = arith.constant dense<0.000000e+00> : vector<2x8xf32>
    %78 = vector.multi_reduction <add>, %77, %cst_19 [1] : vector<2x8x8xf32> to vector<2x8xf32>
    %79 = vector.shape_cast %78 : vector<2x8xf32> to vector<2x1x8xf32>
    %80 = tpu.reciprocal %79 {approx = true} : vector<2x1x8xf32> -> vector<2x1x8xf32>
    %81 = vector.broadcast %80 : vector<2x1x8xf32> to vector<2x8x8xf32>
    %82 = arith.mulf %77, %81 : vector<2x8x8xf32>
    %83 = arith.truncf %82 : vector<2x8x8xf32> to vector<2x8x8xbf16>
    %84 = arith.truncf %0 : vector<2x3x8xf32> to vector<2x3x8xbf16>
    "tpu.trace_start"() <{level = 10 : i32, message = "bdj,bji->bdi"}> : () -> ()
    %cst_20 = arith.constant dense<0.000000e+00> : vector<2x3x8xf32>
    %85 = tpu.matmul %84, %83, %cst_20 {dimension_numbers = #tpu.dot_dimension_numbers<[2], [1], [1], [2], [0, 0, 0, 1, 1, 2], [0], [0]>} : vector<2x3x8xbf16>, vector<2x8x8xbf16>, vector<2x3x8xf32> -> vector<2x3x8xf32>
    "tpu.trace_stop"() : () -> ()
    %cst_21 = arith.constant 0.000000e+00 : f32
    %86 = vector.broadcast %cst_21 : f32 to vector<2x32x8xf32>
    %87 = arith.maximumf %30, %86 : vector<2x32x8xf32>
    %88 = vector.shape_cast %14 : vector<32x1xf32> to vector<1x32x1xf32>
    %89 = vector.broadcast %88 : vector<1x32x1xf32> to vector<2x32x8xf32>
    %90 = arith.mulf %87, %89 : vector<2x32x8xf32>
    %cst_22 = arith.constant dense<0.000000e+00> : vector<2x8xf32>
    %91 = vector.multi_reduction <add>, %90, %cst_22 [1] : vector<2x32x8xf32> to vector<2x8xf32>
    %92 = vector.shape_cast %91 : vector<2x8xf32> to vector<2x1x8xf32>
    %93 = vector.broadcast %6 : f32 to vector<2x1x8xf32>
    %94 = arith.addf %92, %93 : vector<2x1x8xf32>
    %95 = vector.broadcast %94 : vector<2x1x8xf32> to vector<2x3x8xf32>
    %96 = arith.mulf %0, %95 : vector<2x3x8xf32>
    %97 = arith.mulf %96, %85 : vector<2x3x8xf32>
    %cst_23 = arith.constant 9.99999974E-6 : f32
    %98 = vector.broadcast %cst_23 : f32 to vector<2x1x8xf32>
    %99 = arith.addf %23, %98 : vector<2x1x8xf32>
    %100 = tpu.reciprocal %99 {approx = true} : vector<2x1x8xf32> -> vector<2x1x8xf32>
    %101 = vector.broadcast %100 : vector<2x1x8xf32> to vector<2x3x8xf32>
    %102 = arith.mulf %97, %101 : vector<2x3x8xf32>
    %103 = vector.broadcast %1 : vector<2x1x8xf32> to vector<2x3x8xf32>
    %104 = arith.mulf %102, %103 : vector<2x3x8xf32>
    %cst_24 = arith.constant dense<0.000000e+00> : vector<2x3xf32>
    %105 = vector.multi_reduction <add>, %104, %cst_24 [2] : vector<2x3x8xf32> to vector<2x3xf32>
    %106 = vector.shape_cast %105 : vector<2x3xf32> to vector<2x3x1xf32>
    %cst_25 = arith.constant 8.000000e+00 : f32
    %107 = vector.broadcast %cst_25 : f32 to vector<2x3x1xf32>
    %108 = arith.divf %106, %107 : vector<2x3x1xf32>
    %109 = vector.broadcast %108 : vector<2x3x1xf32> to vector<2x3x8xf32>
    %110 = arith.subf %104, %109 : vector<2x3x8xf32>
    %c0_26 = arith.constant 0 : index
    %c0_27 = arith.constant 0 : index
    %c0_28 = arith.constant 0 : index
    %111 = vector.load %arg7[%c0_26, %c0_27, %c0_28] : memref<2x3x8xf32, #tpu.memory_space<vmem>>, vector<2x3x8xf32>
    tpu.vector_store %arg7[%c0_26, %c0_27, %c0_28], %110 {strides = array<i32>} : memref<2x3x8xf32, #tpu.memory_space<vmem>>, vector<2x3x8xf32>,
    return
  }
  func.func @transform_0(%arg0: i32) -> (i32, i32, i32) {
    %c0_i32 = arith.constant 0 : i32
    %c0_i32_0 = arith.constant 0 : i32
    %c0_i32_1 = arith.constant 0 : i32
    return %arg0, %c0_i32, %c0_i32_0 : i32, i32, i32
  }
  func.func @transform_1(%arg0: i32) -> (i32, i32, i32) {
    %c0_i32 = arith.constant 0 : i32
    %c0_i32_0 = arith.constant 0 : i32
    %c0_i32_1 = arith.constant 0 : i32
    return %arg0, %c0_i32, %c0_i32_0 : i32, i32, i32
  }
  func.func @transform_2(%arg0: i32) -> (i32, i32, i32) {
    %c0_i32 = arith.constant 0 : i32
    %c0_i32_0 = arith.constant 0 : i32
    %c0_i32_1 = arith.constant 0 : i32
    return %arg0, %c0_i32, %c0_i32_0 : i32, i32, i32
  }
  func.func @transform_3(%arg0: i32) -> (i32, i32, i32) {
    %c0_i32 = arith.constant 0 : i32
    %c0_i32_0 = arith.constant 0 : i32
    %c0_i32_1 = arith.constant 0 : i32
    return %arg0, %c0_i32, %c0_i32_0 : i32, i32, i32
  }
  func.func @transform_4(%arg0: i32) -> (i32, i32) {
    %c0_i32 = arith.constant 0 : i32
    %c0_i32_0 = arith.constant 0 : i32
    %c0_i32_1 = arith.constant 0 : i32
    return %c0_i32, %c0_i32_0 : i32, i32
  }
  func.func @transform_5(%arg0: i32) -> i32 {
    %c0_i32 = arith.constant 0 : i32
    %c0_i32_0 = arith.constant 0 : i32
    return %c0_i32 : i32
  }
  func.func @transform_6(%arg0: i32) -> (i32, i32, i32) {
    %c0_i32 = arith.constant 0 : i32
    %c0_i32_0 = arith.constant 0 : i32
    %c0_i32_1 = arith.constant 0 : i32
    return %arg0, %c0_i32, %c0_i32_0 : i32, i32, i32
  }
}

</mosaic_0001>

<bundles_post_ra>
// kernel: tpu_custom_call.1
= control target key start
LH: loop header
LB: loop body
LE: loop exit
PB: predicated region body
PF: predicated region fallthrough
CT: control target
= control target key end

     0   :  { %11 = vsyncpa [#allocation3], 0  ;;  %s2030_s0 = inlined_call_operand.vmem [shape: f32[8,3,8], index: 0, kind: input, shape index: {}]   ;;  %s2031_s1 = inlined_call_operand.vmem [shape: f32[8,1,8], index: 1, kind: input, shape index: {}]   ;;  %s2032_s2 = inlined_call_operand.vmem [shape: f32[8,8,8], index: 2, kind: input, shape index: {}]   ;;  %s2033_s3 = inlined_call_operand.hbm [shape: f32[8,8,8], index: 3, kind: input, shape index: {}]   ;;  %s2034_s4 = inlined_call_operand.vmem [shape: f32[32,8], index: 4, kind: input, shape index: {}]   ;;  %s2035_s5 = inlined_call_operand.vmem [shape: f32[2], index: 5, kind: input, shape index: {}]   ;;  %s2036_s6 = inlined_call_operand.vmem [shape: f32[8,3,8], index: 6, kind: output, shape index: {}]  }
   0x1   :  { %13 = vsyncpa [#allocation3 + $0x1], 0 }
   0x2   :  { %14 = vsyncpa [#allocation4], 0  ;;  %s1681_s21 = smov 0   ;;  %s1683_s22 = smov 0  }
   0x3   :  { %s1685_s23 = smov 0   ;;  %s1687_s24 = smov 0  }
   0x4 LB: > { %s1364_s25 = sadd.s32 4294967295, %s1630_s24   ;;  %s1701_s26 = sadd.s32 1, %s1630_s24   ;;  %s1630_s24 = sphi %s1687_s24, %s2049_s24   ;;  %s1626_s23 = sphi %s1685_s23, %s2048_s23   ;;  %s1622_s22 = sphi %s1683_s22, %s2047_s22   ;;  %s1618_s21 = sphi %s1681_s21, %s2046_s21  }
   0x5   : > { %s102_s27 = ssub.s32 %s1630_s24, %s1701_s26  ;;  %s105_s28 = sadd.s32 1, %s1626_s23 }
   0x6   : > { %p103_p0 = scmp.eq.s32.totalorder %s102_s27, 0  ;;  %p112_p1 = scmp.ne.s32.totalorder %s1626_s23, %s1622_s22 }
   0x7   : > { %p113_p2 = scmp.eq.s32.totalorder %s1630_s24, 0  ;;  %p118_p3 = scmp.ne.s32.totalorder %s1622_s22, %s1618_s21 }
   0x8   : > { %s1711_s29 = scalar_select %p103_p0, %s1626_s23, %s105_s28  }
   0x9   : > { %p114_p4 = por %p113_p2, %p112_p1  ;;  %p1715_p5 = scmp.eq.s32.totalorder %s1364_s25, 0 }
   0xa   : > { %p1366_p6 = scmp.ge.s32.totalorder %s1630_s24, 1  ;;  %p197_p7 = scmp.lt.s32.totalorder %s1630_s24, 5 }
   0xb   : > { %p1723_p8 = por %p1715_p5, %p118_p3  ;;  %s213_s11 = sshll.u32 %s2035_s5, 4  ;;  %s214_s11 = int_to_ptr.vmem [resolvable:$true] %s213_s11 }
   0xc   : > { %p1727_p9 = pnand %p1366_p6, %p197_p7  ;;  %p1461_p11 = scmp.lt.s32.totalorder %s1630_s24, 4 }
   0xd   : > { %s2040_s7 = scalar_select %p1723_p8, 1, 0 }
   0xe   : > { %s2041_s8 = scalar_select %p1727_p9, 1, 0 }
   0xf   : > { %p1452_p10 = pneg %p1727_p9  ;;  %s250_s12 = sand.u32 1, %s1626_s23  }
  0x10   : > { %p1744_p13 = pnand %p1461_p11, %p114_p4  ;;  %s1369_s15 = sshll.u32 %s250_s12, 4 }
  0x11   : > { %p1740_p12 = pnand %p1452_p10, %p1715_p5  ;;  %s1547_s16 = scalar_lea.vmem %s214_s11, 16 }
  0x12   : > { %p1548_p0 = scmp.ne.s32.totalorder %s214_s11, %s1547_s16  ;;  %p1555_p6 = scmp.lt.s32.totalorder %s214_s11, %s214_s11 }
  0x13   : > { %p1549_p1 = pneg %p1740_p12  ;;  %p1556_p7 = scmp.lt.s32.totalorder %s1547_s16, %s1547_s16 }
  0x15   : > { %p1550_p2 = pnand %p1549_p1, %p1548_p0  ;;  %p1557_p8 = por %p1556_p7, %p1555_p6 }
  0x17   : > { %p1551_p3 = pneg %p1550_p2 }
  0x19   : > { %p1558_p9 = pnand %p1557_p8, %p1551_p3 }
  0x1b   : > { %1561 = shalt.err (!%p1558_p9)
}
  0x1c   : > { %s1632_s17 = smov [#allocation5]   ;;  %s1393_s18 = sshll.u32 %s1630_s24, 8 }
  0x1d   : > { %1455 = dma.vmem_to_smem (!%p1740_p12), %s214_s11, 16, %s1632_s17, [#allocation4]  }
  0x1e   : > { %s1756_s21 = scalar_lea.hbm %s2033_s3, %s1393_s18  ;;  %s254_s27 = scalar_lea.vmem [#allocation2], %s1369_s15 }
  0x1f   : > { %s261_s28 = sshll.u32 %s254_s27, 4  ;;  %s1760_s9 = scalar_lea.sflag [#allocation3], %s250_s12  ;;  %s1758_s28 = int_to_ptr.vmem [resolvable:$true] %s261_s28 }
  0x20   : > { %s1562_s10 = scalar_lea.hbm %s1756_s21, 256  ;;  %p1564_p8 = pneg %p1744_p13 }
  0x21   : > { %p1563_p4 = scmp.ne.s32.totalorder %s1756_s21, %s1562_s10  ;;  %s1567_s16 = scalar_lea.hbm %s2033_s3, 1024 }
  0x22   : > { %p1568_p11 = scmp.lt.u32.totalorder %s1756_s21, %s2033_s3  ;;  %p1569_p12 = scmp.lt.u32.totalorder %s1567_s16, %s1562_s10 }
  0x23   : > { %p1565_p9 = pnand %p1564_p8, %p1563_p4  ;;  %p1571_p1 = scmp.lt.u32.totalorder %s1562_s10, %s1756_s21 }
  0x24   : > { %p1570_p0 = por %p1569_p12, %p1568_p11 }
  0x25   : > { %p1566_p10 = pneg %p1565_p9 }
  0x26   : > { %p1572_p2 = por %p1571_p1, %p1570_p0 }
  0x28   : > { %p1573_p3 = pnand %p1572_p2, %p1566_p10 }
  0x2a   : > { %1576 = shalt.err (!%p1573_p3)
}
  0x2b   : > { %s1577_s12 = scalar_lea.vmem %s1758_s28, 256  ;;  %s1633_s15 = smov [#allocation2]  }
  0x2c   : > { %p1578_p6 = scmp.ne.s32.totalorder %s1758_s28, %s1577_s12  ;;  %s1582_s19 = sshll.u32 %s1633_s15, 4  ;;  %s1583_s19 = int_to_ptr.vmem [resolvable:$false] %s1582_s19 }
  0x2d   : > { %s1584_s20 = scalar_lea.vmem %s1583_s19, 512  ;;  %p1585_p9 = scmp.lt.s32.totalorder %s1758_s28, %s1583_s19 }
  0x2e   : > { %p1580_p7 = pnand %p1578_p6, %p1564_p8  ;;  %p1586_p11 = scmp.lt.s32.totalorder %s1584_s20, %s1577_s12 }
  0x30   : > { %p1581_p4 = pneg %p1580_p7  ;;  %p1587_p12 = por %p1586_p11, %p1585_p9 }
  0x32   : > { %p1588_p0 = pnand %p1587_p12, %p1581_p4 }
  0x34   : > { %1591 = shalt.err (!%p1588_p0)
}
  0x35   : > { %s1634_s27 = smov 128   ;;  %s1635_s10 = smov 8  }
  0x36   : > { %1459 = dma.hbm_to_vmem [thread:$0]  (!%p1744_p13), %s1756_s21, 256, %s1758_s28, %s1760_s9, %s1634_s27, %s1634_s27, %s1635_s10  }
  0x37   : > { %p2044_p8 = scmp.ne.s32.totalorder %s2041_s8, 0 }
  0x38   : > { %s275_s11 = sand.u32 (!%p2044_p8), 1, %s1622_s22   ;;  %p2045_p10 = scmp.ne.s32.totalorder (!%p2044_p8), %s2040_s7, 0 }
  0x39   : > { %273 = sbr.rel (%p2044_p8) target bundleno = 981 (0x3d5), region = 44  ;;  %s1791_s13 = sshll.u32 (!%p2044_p8), %s275_s11, 4 }
  0x3a   : > { %s276_s16 = scalar_lea.sflag (!%p2044_p8), [#allocation3], %s275_s11  ;;  %s279_s17 = scalar_lea.vmem (!%p2044_p8), [#allocation2], %s1791_s13 }
  0x40   : > { %1609 = dma.done.wait (%p2045_p10), %s276_s16, 256  }
  0x41   : > { %1611 = vsyncadd (%p2045_p10), %s276_s16, 4294967040 }
  0x42   : > { %1613 = dma.done.wait (%p1715_p5), [#allocation4], 16  }
  0x43   : > { %1615 = vsyncadd (%p1715_p5), [#allocation4], 4294967280 }
  0x44   : > { %288 = sfence }
  0x45   : > { %v1805_v0 = vld [vmem:[%s2034_s4] sm:$0xff]  ;;  %v1636_v1 = vmov 3   ;;  %v1637_v2 = vmov 2   ;;  %v1812_v3 = vld [vmem:[%s2034_s4 + $0x8] sm:$0xff]  ;;  %v1819_v4 = vld [vmem:[%s2034_s4 + $0x10] sm:$0xff]  ;;  %v1638_v6 = vmov 4   ;;  %v396_v19 = vlaneseq }
  0x46   : > { %1509 = vset.pattern.permute.xlu1 %v1636_v1  ;;  %1508 = vset.pattern.permute.xlu0 %v1637_v2  ;;  %v1824_v5 = vld [vmem:[%s2034_s4 + $0x18] sm:$0xff]  ;;  %v1639_v7 = vmov 5   ;;  %v1640_v8 = vmov 0   ;;  %v1641_v9 = vmov 1   ;;  %s1375_s12 = sshll.u32 %s1364_s25, 1  ;;  %v1642_v11 = vmov 0.0  }
  0x47   : > { %497 = vperm.xlu1 %1509, %v1805_v0   ;;  %465 = vperm.xlu0 %1508, %v1805_v0   ;;  %p328_p5 = scmp.lt.s32.totalorder %s1375_s12, 7  ;;  %v359_v10 = vld [vmem:[%s279_s17 + $0x8] sm:$0xff]  ;;  %vm1643_vm0 = vmmov 0   ;;  %v358_v13 = vld [vmem:[%s279_s17] sm:$0xff]  ;;  %v1873_v21 = vshrl.u32 %v396_v19, 7  ;;  %vm632_vm3 = vcmask 64512  }
  0x48   : > { %1413 = vmatprep.subr.mxu1 %v1642_v11  ;;  %1415 = vmatprep.mubr.msk.f32.mxu1 %vm1643_vm0, %v1642_v11  ;;  %vm904_vm6 = vcmask 261120   ;;  %s364_s13 = sld [smem:[#allocation5]]  ;;  %vm1055_vm12 = vcmask 1043456   ;;  %s1382_s16 = sld [smem:[#allocation5 + $0x1]]  ;;  %vm1238_vm13 = vcmask 59392  }
  0x49   : > { %s2051_s12 = smov (!%p328_p5, %s1375_s12), 7  ;;  %1414 = vmatpush3.msra.mxu1 %v359_v10  ;;  %1408 = vmatprep.subr.mxu0 %v1642_v11  ;;  %v490_v25 = vsub.s32 1, %v1873_v21  ;;  %v1881_v26 = vsub.s32 0, %v1873_v21  ;;  %v530_v30 = vsub.s32 2, %v1873_v21 }
  0x4a   : > { %s1379_s15 = sshll.u32 %s2051_s12, 3  ;;  %1426 = vmatprep.subr.bf16.mxu1 %v1642_v11  ;;  %1410 = vmatprep.mubr.msk.f32.mxu0 %vm1643_vm0, %v1642_v11  ;;  %s1376_s20 = sshll.u32 %s2051_s12, 2 }
  0x4b   : > { %501 = vperm.xlu1 %1509, %v1812_v3   ;;  %469 = vperm.xlu0 %1508, %v1812_v3   ;;  %s342_s19 = scalar_lea.vmem %s2032_s2, %s1379_s15  ;;  %s331_s11 = scalar_lea.vmem %s2030_s0, %s1376_s20 }
  0x4c   : > { %v357_v12 = vld [vmem:[%s342_s19 + $0x8] sm:$0xff]  ;;  %1409 = vmatpush3.msra.mxu0 %v358_v13  ;;  %v356_v14 = vld [vmem:[%s342_s19] sm:$0xff]  ;;  %s336_s14 = scalar_lea.vmem %s2031_s1, %s2051_s12  ;;  %s349_s30 = scalar_lea.vmem %s2036_s6, %s1376_s20 }
  0x4d   : > { %1418 = vmatprep.subr.bf16.mxu0 %v1642_v11  ;;  %v1875_v22 = vld [vmem:[%s331_s11 + $0x4] sm:$0x7]  ;;  %v1883_v28 = vld [vmem:[%s331_s11] sm:$0x7] }
  0x4e   : > { %v367_v24 = vmul.f32 %v1875_v22, %v1875_v22  ;;  %v491_v32 = vrot.slane %v1883_v28, %v490_v25  ;;  %v495_v33 = vrot.slane %v1875_v22, %v490_v25  ;;  %v459_v34 = vrot.slane %v1883_v28, %v1881_v26 }
  0x4f   : > { %1510 = vset.pattern.permute.xlu1 %v1637_v2  ;;  %473 = vperm.xlu0 %1508, %v1819_v4   ;;  %v463_v35 = vrot.slane %v1875_v22, %v1881_v26  ;;  %v531_v39 = vrot.slane %v1883_v28, %v530_v30  ;;  %v535_v40 = vrot.slane %v1875_v22, %v530_v30 }
  0x50   : > { %477 = vperm.xlu1 %1510, %v1824_v5   ;;  %v371_v29 = vrot.slane %v367_v24, 1  ;;  %v377_v38 = vrot.slane %v367_v24, 2 }
  0x52   : > { %v375_v37 = vadd.f32 %v371_v29, %v367_v24 }
  0x53   : > { %1511 = vset.pattern.permute.xlu0 %v1636_v1 }
  0x54   : > { %1512 = vset.pattern.permute.xlu1 %v1636_v1  ;;  %505 = vperm.xlu0 %1511, %v1819_v4   ;;  %v1894_v47 = vadd.f32 %v377_v38, %v375_v37 }
  0x55   : > { %509 = vperm.xlu1 %1512, %v1824_v5  }
  0x56   : > { %1527 = vrsqrt.f32 %v1894_v47  ;;  %vm391_vm1 = vcmp.eq.f32.partialorder %v1894_v47, inf  ;;  %vm393_vm2 = vcmp.eq.f32.partialorder %v1894_v47, 0.0 }
  0x58   : > { %1514 = vset.pattern.permute.xlu0 %v1638_v6 }
  0x59   : > { %1513 = vset.pattern.permute.xlu1 %v1638_v6  ;;  %541 = vperm.xlu0 %1514, %v1812_v3  }
  0x5a   : > { %537 = vperm.xlu1 %1513, %v1805_v0  }
  0x5d   : > { %1515 = vset.pattern.permute.xlu0 %v1639_v7 }
  0x5e   : > { %545 = vperm.xlu1 %1513, %v1819_v4   ;;  %569 = vperm.xlu0 %1515, %v1805_v0  }
  0x62   : > { %549 = vperm.xlu1 %1513, %v1824_v5   ;;  %581 = vperm.xlu0 %1515, %v1824_v5  }
  0x66   : > { %1516 = vset.pattern.permute.xlu1 %v1639_v7  ;;  %1518 = vset.pattern.permute.xlu0 %v1640_v8 }
  0x67   : > { %573 = vperm.xlu1 %1516, %v1812_v3   ;;  %411 = vperm.xlu0 %1518, %v1812_v3  }
  0x6b   : > { %577 = vperm.xlu1 %1516, %v1819_v4   ;;  %416 = vperm.xlu0 %1518, %v1819_v4  }
  0x6f   : > { %1517 = vset.pattern.permute.xlu1 %v1640_v8  ;;  %1521 = vset.pattern.permute.xlu0 %v1641_v9 }
  0x70   : > { %406 = vperm.xlu1 %1517, %v1805_v0   ;;  %441 = vperm.xlu0 %1521, %v1819_v4  }
  0x74   : > { %1519 = vset.pattern.permute.xlu1 %v1641_v9 }
  0x75   : > { %433 = vperm.xlu1 %1519, %v1805_v0  }
  0x79   : > { %437 = vperm.xlu1 %1519, %v1812_v3  }
  0x7d   : > { %1520 = vset.pattern.permute.xlu1 %v1640_v8 }
  0x7e   : > { %421 = vperm.xlu1 %1520, %v1824_v5  }
  0x82   : > { %1522 = vset.pattern.permute.xlu1 %v1641_v9 }
  0x83   : > { %445 = vperm.xlu1 %1522, %v1824_v5  }
  0x8e   : > { %706 = vxpose.xlu0.b32.start.end [1/1] (short) (narrow) %v357_v12, 8 }
  0xac   : > { %600 = vxpose.xlu1.b32.start.end [1/1] (short) (narrow) %v356_v14, 8 }
  0xc6   : > { %v498_v15 = vpop.permute.xlu1 %497  ;;  %v466_v16 = vpop.permute.xlu0 %465 }
  0xc7   : > { %v512_v41 = vmul.f32 %v498_v15, %v491_v32  ;;  %v516_v42 = vmul.f32 %v498_v15, %v495_v33  ;;  %v480_v43 = vmul.f32 %v466_v16, %v459_v34  ;;  %v484_v44 = vmul.f32 %v466_v16, %v463_v35 }
  0xc9   : > { %v520_v54 = vadd.f32 %v512_v41, %v480_v43  ;;  %v524_v55 = vadd.f32 %v516_v42, %v484_v44 }
  0xca   : > { %v502_v17 = vpop.permute.xlu1 %501  ;;  %v470_v18 = vpop.permute.xlu0 %469 }
  0xcb   : > { %v513_v48 = vmul.f32 %v502_v17, %v491_v32  ;;  %v517_v50 = vmul.f32 %v502_v17, %v495_v33  ;;  %v481_v51 = vmul.f32 %v470_v18, %v459_v34  ;;  %v485_v52 = vmul.f32 %v470_v18, %v463_v35 }
  0xcd   : > { %v521_v7 = vadd.f32 %v513_v48, %v481_v51  ;;  %v525_v8 = vadd.f32 %v517_v50, %v485_v52  ;;  %v1644_v48 = vmov 6   ;;  %v1528_v50 = vpop.eup %1527  ;;  %v366_v52 = vmul.f32 %v1883_v28, %v1883_v28 }
  0xce   : > { %v474_v23 = vpop.permute.xlu0 %473  ;;  %v390_v51 = vmul.f32 %v1528_v50, %v1894_v47 }
  0xcf   : > { %v478_v20 = vpop.permute.xlu1 %477  ;;  %v482_v13 = vmul.f32 %v474_v23, %v459_v34  ;;  %v486_v14 = vmul.f32 %v474_v23, %v463_v35 }
  0xd0   : > { %v483_v58 = vmul.f32 %v478_v20, %v459_v34  ;;  %v487_v59 = vmul.f32 %v478_v20, %v463_v35 }
  0xd3   : > { %v506_v31 = vpop.permute.xlu0 %505 }
  0xd4   : > { %v510_v27 = vpop.permute.xlu1 %509  ;;  %v514_v63 = vmul.f32 %v506_v31, %v491_v32  ;;  %v518_v1 = vmul.f32 %v506_v31, %v495_v33 }
  0xd5   : > { %v515_v56 = vmul.f32 %v510_v27, %v491_v32  ;;  %v519_v57 = vmul.f32 %v510_v27, %v495_v33 }
  0xd6   : > { %v522_v25 = vadd.f32 %v514_v63, %v482_v13  ;;  %v526_v27 = vadd.f32 %v518_v1, %v486_v14 }
  0xd7   : > { %v523_v15 = vadd.f32 %v515_v56, %v483_v58  ;;  %v527_v16 = vadd.f32 %v519_v57, %v487_v59  ;;  %v1645_v56 = vmov 7   ;;  %v370_v57 = vrot.slane %v366_v52, 1 }
  0xd8   : > { %v542_v45 = vpop.permute.xlu0 %541 }
  0xd9   : > { %v538_v36 = vpop.permute.xlu1 %537  ;;  %v553_v60 = vmul.f32 %v542_v45, %v531_v39  ;;  %v557_v61 = vmul.f32 %v542_v45, %v535_v40 }
  0xda   : > { %v552_v49 = vmul.f32 %v538_v36, %v531_v39  ;;  %v556_v53 = vmul.f32 %v538_v36, %v535_v40 }
  0xdb   : > { %v561_v24 = vadd.f32 %v553_v60, %v521_v7  ;;  %v565_v20 = vadd.f32 %v557_v61, %v525_v8  ;;  %v374_v61 = vadd.f32 %v370_v57, %v366_v52 }
  0xdc   : > { %v560_v2 = vadd.f32 %v552_v49, %v520_v54  ;;  %v564_v10 = vadd.f32 %v556_v53, %v524_v55  ;;  %v394_v54 = vand.u32 2147483648, %v1894_v47  ;;  %v392_v55 = vsel %vm391_vm1, %v1894_v47, %v390_v51 }
  0xdd   : > { %v546_v46 = vpop.permute.xlu1 %545  ;;  %v570_v9 = vpop.permute.xlu0 %569 }
  0xde   : > { %v554_v17 = vmul.f32 %v546_v46, %v531_v39  ;;  %v558_v18 = vmul.f32 %v546_v46, %v535_v40  ;;  %v584_v29 = vadd.f32 %v570_v9, %v560_v2  ;;  %v588_v32 = vadd.f32 %v570_v9, %v564_v10 }
  0xdf   : > { %v1909_v59 = vsel %vm393_vm2, %v394_v54, %v392_v55 }
  0xe0   : > { %v562_v34 = vadd.f32 %v554_v17, %v522_v25  ;;  %v566_v23 = vadd.f32 %v558_v18, %v526_v27  ;;  %v403_v63 = vrot.slane %v1909_v59, %v1881_v26 }
  0xe1   : > { %v550_v62 = vpop.permute.xlu1 %549  ;;  %v582_v33 = vpop.permute.xlu0 %581 }
  0xe2   : > { %v555_v6 = vmul.f32 %v550_v62, %v531_v39  ;;  %v559_v12 = vmul.f32 %v550_v62, %v535_v40  ;;  %v376_v62 = vrot.slane %v366_v52, 2 }
  0xe4   : > { %v563_v30 = vadd.f32 %v555_v6, %v523_v15  ;;  %v567_v36 = vadd.f32 %v559_v12, %v527_v16  ;;  %v380_v2 = vadd.f32 %v376_v62, %v374_v61 }
  0xe6   : > { %v574_v31 = vpop.permute.xlu1 %573  ;;  %v587_v35 = vadd.f32 %v582_v33, %v563_v30  ;;  %v591_v39 = vadd.f32 %v582_v33, %v567_v36  ;;  %v412_v58 = vpop.permute.xlu0 %411  ;;  %1529 = vrsqrt.f32 %v380_v2  ;;  %vm384_vm4 = vcmp.eq.f32.partialorder %v380_v2, inf }
  0xe7   : > { %v585_v37 = vadd.f32 %v574_v31, %v561_v24  ;;  %v589_v38 = vadd.f32 %v574_v31, %v565_v20  ;;  %v429_v6 = vmul.f32 %v412_v58, %v403_v63  ;;  %v387_v18 = vand.u32 2147483648, %v380_v2 }
  0xe8   : > { %vm386_vm5 = vcmp.eq.f32.partialorder %v380_v2, 0.0 }
  0xe9   : > { %v592_v41 = vpack.c.bf16 %v585_v37, %v584_v29  ;;  %v594_v42 = vpack.c.bf16 %v589_v38, %v588_v32 }
  0xea   : > { %v578_v43 = vpop.permute.xlu1 %577  ;;  %v417_v47 = vpop.permute.xlu0 %416 }
  0xeb   : > { %v586_v40 = vadd.f32 %v578_v43, %v562_v34  ;;  %v590_v44 = vadd.f32 %v578_v43, %v566_v23  ;;  %948 = vxpose.xlu1.c.b16.start [1/2] (short) (narrow) %v594_v42, 16  ;;  %888 = vxpose.xlu0.c.b16.start [1/2] (short) (narrow) %v592_v41, 16  ;;  %v430_v7 = vmul.f32 %v417_v47, %v403_v63 }
  0xed   : > { %v593_v45 = vpack.c.bf16 %v587_v35, %v586_v40  ;;  %v595_v46 = vpack.c.bf16 %v591_v39, %v590_v44 }
  0xef   : > { %949 = vxpose.xlu1.c.b16.end [2/2] (short) (narrow) %v595_v46, 16  ;;  %889 = vxpose.xlu0.c.b16.end [2/2] (short) (narrow) %v593_v45, 16  ;;  %v407_v49 = vpop.permute.xlu1 %406  ;;  %v442_v8 = vpop.permute.xlu0 %441 }
  0xf0   : > { %v1920_v13 = vadd.f32 %v442_v8, %v430_v7  ;;  %v1530_v16 = vpop.eup %1529 }
  0xf1   : > { %v383_v17 = vmul.f32 %v1530_v16, %v380_v2 }
  0xf3   : > { %1524 = vset.pattern.permute.xlu1 %v1644_v48  ;;  %v385_v24 = vsel %vm384_vm4, %v380_v2, %v383_v17 }
  0xf4   : > { %841 = vperm.xlu1 %1524, %v1812_v3   ;;  %v434_v53 = vpop.permute.xlu1 %433  ;;  %v1933_v20 = vsel %vm386_vm5, %v387_v18, %v385_v24 }
  0xf5   : > { %v399_v25 = vrot.slane %v1933_v20, %v1881_v26 }
  0xf7   : > { %v424_v27 = vmul.f32 %v407_v49, %v399_v25  ;;  %v425_v29 = vmul.f32 %v412_v58, %v399_v25  ;;  %v426_v32 = vmul.f32 %v417_v47, %v399_v25 }
  0xf8   : > { %845 = vperm.xlu1 %1524, %v1819_v4   ;;  %1523 = vset.pattern.permute.xlu0 %v1644_v48  ;;  %v438_v60 = vpop.permute.xlu1 %437 }
  0xf9   : > { %837 = vperm.xlu0 %1523, %v1805_v0   ;;  %v1937_v30 = vadd.f32 %v434_v53, %v424_v27  ;;  %v1939_v31 = vadd.f32 %v438_v60, %v425_v29  ;;  %v1943_v37 = vadd.f32 %v442_v8, %v426_v32  ;;  %v814_v32 = vand.u32 127, %v396_v19 }
  0xfb   : > { %v596_v36 = vpack.c.bf16 %v1939_v31, %v1937_v30  ;;  %vm815_vm11 = vcmp.ne.s32.totalorder %v1873_v21, %v814_v32 }
  0xfc   : > { %1525 = vset.pattern.permute.xlu1 %v1645_v56 }
  0xfd   : > { %1154 = vperm.xlu1 %1525, %v1805_v0   ;;  %849 = vperm.xlu0 %1523, %v1824_v5   ;;  %v422_v1 = vpop.permute.xlu1 %421  ;;  %v428_v0 = vmul.f32 %v407_v49, %v403_v63 }
  0xfe   : > { %v431_v9 = vmul.f32 %v422_v1, %v403_v63  ;;  %v427_v33 = vmul.f32 %v422_v1, %v399_v25 }
  0xff   : > { %v1916_v12 = vadd.f32 %v434_v53, %v428_v0 }
 0x101   : > { %1162 = vperm.xlu1 %1525, %v1819_v4   ;;  %1526 = vset.pattern.permute.xlu0 %v1645_v56  ;;  %v1918_v4 = vadd.f32 %v438_v60, %v429_v6 }
 0x102   : > { %1158 = vperm.xlu0 %1526, %v1812_v3   ;;  %v446_v10 = vpop.permute.xlu1 %445 }
 0x103   : > { %v1922_v3 = vadd.f32 %v446_v10, %v431_v9  ;;  %v598_v14 = vpack.c.bf16 %v1918_v4, %v1916_v12  ;;  %v1945_v38 = vadd.f32 %v446_v10, %v427_v33 }
 0x105   : > { %1166 = vperm.xlu1 %1525, %v1824_v5   ;;  %v599_v15 = vpack.c.bf16 %v1922_v3, %v1920_v13  ;;  %v597_v42 = vpack.c.bf16 %v1945_v38, %v1943_v37 }
 0x10e   : > { %v722_v5 = vpop.trf.xlu0 }
 0x10f   : > { %1416 = vmatmul.mubr.msk.f32.vlgmr.msra.gmra.mrb[0].mxu1 %vm632_vm3, %v722_v5 }
 0x110   : > { %1427 = vmatpush3.bf16.msra.mxu1 %v598_v14  ;;  %1430 = vmatprep.mubr.msk.bf16.mxu1 %vm1643_vm0, %v1642_v11 }
 0x111   : > { %1428 = vmatprep.subr.bf16.mxu1 %v1642_v11 }
 0x114   : > { %1429 = vmatpush3.bf16.msra.mxu1 %v599_v15 }
 0x115   : > { %1440 = vmatprep.subr.bf16.mxu1 %v1642_v11 }
 0x12c   : > { %v616_v41 = vpop.trf.xlu1 }
 0x12d   : > { %1411 = vmatmul.mubr.msk.f32.vlgmr.msra.gmra.mrb[0].mxu0 %vm632_vm3, %v616_v41 }
 0x12e   : > { %1419 = vmatpush3.bf16.msra.mxu0 %v596_v36  ;;  %1422 = vmatprep.mubr.msk.bf16.mxu0 %vm1643_vm0, %v1642_v11 }
 0x12f   : > { %1420 = vmatprep.subr.bf16.mxu0 %v1642_v11 }
 0x132   : > { %1421 = vmatpush3.bf16.msra.mxu0 %v597_v42 }
 0x133   : > { %1434 = vmatprep.subr.bf16.mxu0 %v1642_v11 }
 0x151   : > { %v956_v34 = vpop.trf.xlu1  ;;  %v896_v23 = vpop.trf.xlu0 }
 0x152   : > { %1423 = vmatmul.mubr.msk.bf16.vlgmr.msra.gmra.mrb[4].mxu0 %vm904_vm6, %v896_v23  ;;  %1431 = vmatmul.mubr.msk.bf16.vlgmr.msra.gmra.mrb[4].mxu1 %vm904_vm6, %v956_v34 }
 0x153   : > { %1436 = vmatprep.mubr.msk.bf16.mxu0 %vm1643_vm0, %v1642_v11  ;;  %1442 = vmatprep.mubr.msk.bf16.mxu1 %vm1643_vm0, %v1642_v11 }
 0x173   : > { %v842_v39 = vpop.permute.xlu1 %841 }
 0x174   : > { %v853_v46 = vmul.f32 %v842_v39, %v1939_v31  ;;  %v857_v48 = vmul.f32 %v842_v39, %v1918_v4 }
 0x176   : > { %v861_v11 = vsel %vm632_vm3, %v853_v46, 0.0  ;;  %v874_v54 = vsel %vm632_vm3, %v857_v48, 0.0 }
 0x177   : > { %v846_v49 = vpop.permute.xlu1 %845 }
 0x178   : > { %v838_v40 = vpop.permute.xlu0 %837  ;;  %v854_v55 = vmul.f32 %v846_v49, %v1943_v37  ;;  %v858_v56 = vmul.f32 %v846_v49, %v1920_v13 }
 0x179   : > { %v852_v44 = vmul.f32 %v838_v40, %v1937_v30  ;;  %v856_v45 = vmul.f32 %v838_v40, %v1916_v12 }
 0x17a   : > { %v863_v63 = vsel %vm632_vm3, %v854_v55, 0.0  ;;  %v876_v47 = vsel %vm632_vm3, %v858_v56, 0.0 }
 0x17b   : > { %v860_v50 = vsel %vm632_vm3, %v852_v44, 0.0  ;;  %v873_v51 = vsel %vm632_vm3, %v856_v45, 0.0 }
 0x17c   : > { %v850_v52 = vpop.permute.xlu0 %849  ;;  %v862_v58 = vadd.f32 %v861_v11, %v860_v50  ;;  %v875_v60 = vadd.f32 %v874_v54, %v873_v51  ;;  %v1007_v51 = vstv %s364_s13 }
 0x17d   : > { %v855_v61 = vmul.f32 %v850_v52, %v1945_v38  ;;  %v859_v62 = vmul.f32 %v850_v52, %v1922_v3 }
 0x17e   : > { %v877_v2 = vadd.f32 %v876_v47, %v875_v60  ;;  %v864_v0 = vadd.f32 %v863_v63, %v862_v58 }
 0x17f   : > { %v865_v7 = vsel %vm632_vm3, %v855_v61, 0.0  ;;  %v878_v8 = vsel %vm632_vm3, %v859_v62, 0.0 }
 0x180   : > { %v866_v9 = vadd.f32 %v865_v7, %v864_v0  ;;  %v879_v10 = vadd.f32 %v878_v8, %v877_v2 }
 0x182   : > { %v867_v14 = vrot.slane %v866_v9, 4  ;;  %v880_v5 = vrot.slane %v879_v10, 4 }
 0x184   : > { %v868_v15 = vadd.f32 %v867_v14, %v866_v9  ;;  %v881_v16 = vadd.f32 %v880_v5, %v879_v10 }
 0x186   : > { %v869_v24 = vrot.slane %v868_v15, 2  ;;  %v882_v25 = vrot.slane %v881_v16, 2 }
 0x188   : > { %v870_v36 = vadd.f32 %v869_v24, %v868_v15  ;;  %v883_v42 = vadd.f32 %v882_v25, %v881_v16 }
 0x18a   : > { %v884_v40 = vrot.slane %v883_v42, 1 }
 0x18c   : > { %v885_v48 = vadd.f32 %v884_v40, %v883_v42 }
 0x1e2   : > { %v807_v35 = vpop.f32.mrb[0].mxu1 }
 0x1e3   : > { %v1417_v43 = vpop.f32.mrb[1].mxu1  ;;  %v817_v1 = vmax.f32 %v807_v35, 0.0 }
 0x1e4   : > { %v871_v43 = vrot.slane %v870_v36, 1 }
 0x1e5   : > { %1531 = vrsqrt.f32 %v817_v1  ;;  %vm827_vm8 = vcmp.eq.f32.partialorder %v817_v1, inf  ;;  %v830_v41 = vand.u32 2147483648, %v817_v1  ;;  %vm829_vm10 = vcmp.eq.f32.partialorder %v817_v1, 0.0 }
 0x1e6   : > { %v872_v46 = vadd.f32 %v871_v43, %v870_v36 }
 0x1ef   : > { %v1532_v17 = vpop.eup %1531 }
 0x1f0   : > { %v826_v29 = vmul.f32 %v1532_v17, %v817_v1 }
 0x1f2   : > { %v828_v23 = vsel %vm827_vm8, %v817_v1, %v826_v29 }
 0x1f3   : > { %v831_v39 = vsel %vm829_vm10, %v830_v41, %v828_v23 }
 0x1f4   : > { %v835_v45 = vsel %vm815_vm11, %v831_v39, 0.0 }
 0x1f5   : > { %v887_v49 = vmul.f32 %v885_v48, %v835_v45 }
 0x200   : > { %v702_v53 = vpop.f32.mrb[0].mxu0 }
 0x201   : > { %v1412_v57 = vpop.f32.mrb[1].mxu0  ;;  %v816_v6 = vmax.f32 %v702_v53, 0.0 }
 0x203   : > { %1533 = vrsqrt.f32 %v816_v6  ;;  %vm820_vm7 = vcmp.eq.f32.partialorder %v816_v6, inf  ;;  %v823_v33 = vand.u32 2147483648, %v816_v6  ;;  %vm822_vm9 = vcmp.eq.f32.partialorder %v816_v6, 0.0 }
 0x20d   : > { %v1534_v18 = vpop.eup %1533 }
 0x20e   : > { %v819_v27 = vmul.f32 %v1534_v18, %v816_v6 }
 0x210   : > { %v821_v34 = vsel %vm820_vm7, %v816_v6, %v819_v27 }
 0x211   : > { %v824_v35 = vsel %vm822_vm9, %v823_v33, %v821_v34 }
 0x212   : > { %v834_v44 = vsel %vm815_vm11, %v824_v35, 0.0 }
 0x213   : > { %v886_v19 = vmul.f32 %v872_v46, %v834_v44 }
 0x225   : > { %v942_v50 = vpop.f32.mrb[4].mxu0  ;;  %v1001_v52 = vpop.f32.mrb[4].mxu1 }
 0x226   : > { %v943_v53 = vadd.f32 %v942_v50, %v886_v19  ;;  %v1002_v11 = vadd.f32 %v1001_v52, %v887_v49  ;;  %v1424_v54 = vpop.f32.mrb[5].mxu0  ;;  %v1432_v55 = vpop.f32.mrb[5].mxu1 }
 0x227   : > { %v945_v56 = vpop.f32.mrb[6].mxu0  ;;  %v1004_v57 = vpop.f32.mrb[6].mxu1  ;;  %v1051_v54 = vpack.c.bf16 %v1875_v22, %v1875_v22 }
 0x228   : > { %v1008_v21 = vadd.f32 %v1007_v51, %v943_v53  ;;  %v1009_v58 = vadd.f32 %v1007_v51, %v1002_v11  ;;  %v1425_v60 = vpop.f32.mrb[7].mxu0  ;;  %v1433_v61 = vpop.f32.mrb[7].mxu1  ;;  %v1050_v53 = vpack.c.bf16 %v1883_v28, %v1883_v28  ;;  %v1146_v57 = vmax.f32 %v1939_v31, 0.0 }
 0x229   : > { %v1155_v55 = vpop.permute.xlu1 %1154  ;;  %v1159_v56 = vpop.permute.xlu0 %1158  ;;  %v1145_v60 = vmax.f32 %v1937_v30, 0.0  ;;  %v1148_v30 = vmax.f32 %v1945_v38, 0.0 }
 0x22a   : > { %v1010_v62 = vsel %vm632_vm3, %v1008_v21, -inf  ;;  %v1017_v63 = vsel %vm632_vm3, %v1009_v58, -inf  ;;  %v1170_v61 = vmul.f32 %v1159_v56, %v1146_v57 }
 0x22b   : > { %v1011_v47 = vrot.slane %v1010_v62, 4  ;;  %v1018_v1 = vrot.slane %v1017_v63, 4 }
 0x22d   : > { %v1012_v2 = vmax.f32 %v1010_v62, %v1011_v47  ;;  %v1019_v0 = vmax.f32 %v1017_v63, %v1018_v1  ;;  %v1149_v62 = vmax.f32 %v1916_v12, 0.0  ;;  %v1169_v47 = vmul.f32 %v1155_v55, %v1145_v60 }
 0x22f   : > { %v1013_v6 = vrot.slane %v1012_v2, 2  ;;  %v1020_v7 = vrot.slane %v1019_v0, 2  ;;  %v1173_v1 = vmul.f32 %v1155_v55, %v1149_v62 }
 0x231   : > { %v1014_v8 = vmax.f32 %v1012_v2, %v1013_v6  ;;  %v1021_v9 = vmax.f32 %v1019_v0, %v1020_v7  ;;  %v1147_v2 = vmax.f32 %v1943_v37, 0.0  ;;  %v1178_v0 = vsel %vm632_vm3, %v1170_v61, 0.0  ;;  %v1390_v61 = vld [vmem:[%s336_s14 + $0x1] ss:$0 sm:$0xff] }
 0x232   : > { %v1151_v6 = vmax.f32 %v1920_v13, 0.0 }
 0x233   : > { %v1015_v10 = vrot.slane %v1014_v8, 1  ;;  %v1022_v14 = vrot.slane %v1021_v9, 1 }
 0x235   : > { %v1016_v5 = vmax.f32 %v1014_v8, %v1015_v10  ;;  %v1023_v15 = vmax.f32 %v1021_v9, %v1022_v14  ;;  %v1177_v8 = vsel %vm632_vm3, %v1169_v47, 0.0  ;;  %v1190_v9 = vsel %vm632_vm3, %v1173_v1, 0.0 }
 0x236   : > { %v1179_v10 = vadd.f32 %v1178_v0, %v1177_v8  ;;  %v1152_v14 = vmax.f32 %v1922_v3, 0.0 }
 0x237   : > { %v1024_v16 = vsub.f32 %v1008_v21, %v1016_v5  ;;  %v1025_v17 = vsub.f32 %v1009_v58, %v1023_v15  ;;  %v1163_v21 = vpop.permute.xlu1 %1162  ;;  %v1150_v58 = vmax.f32 %v1918_v4, 0.0 }
 0x238   : > { %v1171_v4 = vmul.f32 %v1163_v21, %v1147_v2  ;;  %v1175_v12 = vmul.f32 %v1163_v21, %v1151_v6  ;;  %v1389_v21 = vld [vmem:[%s336_s14] ss:$0 sm:$0xff] }
 0x239   : > { %v1026_v18 = vmul.f32 1.442695, %v1024_v16  ;;  %v1028_v24 = vmul.f32 1.442695, %v1025_v17  ;;  %v1174_v63 = vmul.f32 %v1159_v56, %v1150_v58 }
 0x23a   : > { %v1180_v16 = vsel %vm632_vm3, %v1171_v4, 0.0  ;;  %v1193_v13 = vsel %vm632_vm3, %v1175_v12, 0.0 }
 0x23b   : > { %1535 = vpow2.f32 %v1026_v18  ;;  %v1191_v7 = vsel %vm632_vm3, %v1174_v63, 0.0  ;;  %v1167_v31 = vpop.permute.xlu1 %1166  ;;  %v1181_v17 = vadd.f32 %v1180_v16, %v1179_v10 }
 0x23c   : > { %1537 = vpow2.f32 %v1028_v24  ;;  %v1192_v5 = vadd.f32 %v1191_v7, %v1190_v9  ;;  %v1172_v37 = vmul.f32 %v1167_v31, %v1148_v30  ;;  %v1176_v15 = vmul.f32 %v1167_v31, %v1152_v14 }
 0x23e   : > { %v1182_v18 = vsel %vm632_vm3, %v1172_v37, 0.0  ;;  %v1194_v24 = vadd.f32 %v1193_v13, %v1192_v5 }
 0x23f   : > { %v1183_v38 = vadd.f32 %v1182_v18, %v1181_v17 }
 0x245   : > { %v1536_v25 = vpop.eup %1535 }
 0x246   : > { %v1538_v27 = vpop.eup %1537  ;;  %v1030_v29 = vsel %vm632_vm3, %v1536_v25, 0.0 }
 0x247   : > { %v1031_v32 = vrot.slane %v1030_v29, 4  ;;  %v1037_v33 = vsel %vm632_vm3, %v1538_v27, 0.0 }
 0x248   : > { %v1038_v36 = vrot.slane %v1037_v33, 4 }
 0x249   : > { %v1032_v41 = vadd.f32 %v1031_v32, %v1030_v29  ;;  %v1184_v29 = vrot.slane %v1183_v38, 4 }
 0x24a   : > { %v1039_v42 = vadd.f32 %v1038_v36, %v1037_v33 }
 0x24b   : > { %v1033_v34 = vrot.slane %v1032_v41, 2  ;;  %v1185_v33 = vadd.f32 %v1184_v29, %v1183_v38 }
 0x24c   : > { %v1040_v23 = vrot.slane %v1039_v42, 2 }
 0x24d   : > { %v1034_v35 = vadd.f32 %v1033_v34, %v1032_v41  ;;  %v1186_v3 = vrot.slane %v1185_v33, 2  ;;  %v1211_v34 = vadd.f32 1e-05, %v1909_v59 }
 0x24e   : > { %v1041_v43 = vadd.f32 %v1040_v23, %v1039_v42  ;;  %v1210_v42 = vadd.f32 1e-05, %v1933_v20 }
 0x24f   : > { %v1035_v39 = vrot.slane %v1034_v35, 1  ;;  %v1187_v23 = vadd.f32 %v1186_v3, %v1185_v33 }
 0x250   : > { %v1042_v40 = vrot.slane %v1041_v43, 1 }
 0x251   : > { %v1036_v44 = vadd.f32 %v1035_v39, %v1034_v35 }
 0x252   : > { %v1043_v45 = vadd.f32 %v1042_v40, %v1041_v43  ;;  %v1188_v43 = vrot.slane %v1187_v23, 1 }
 0x253   : > { %1539 = vrcp.f32 %v1036_v44  ;;  %v1203_v44 = vstv %s1382_s16 }
 0x254   : > { %1541 = vrcp.f32 %v1043_v45  ;;  %v1189_v40 = vadd.f32 %v1188_v43, %v1187_v23 }
 0x255   : > { %1543 = vrcp.f32 %v1210_v42 }
 0x256   : > { %1545 = vrcp.f32 %v1211_v34 }
 0x25d   : > { %v1540_v46 = vpop.eup %1539 }
 0x25e   : > { %v1542_v48 = vpop.eup %1541  ;;  %v1046_v19 = vmul.f32 %v1540_v46, %v1536_v25  ;;  %v1195_v25 = vsel %vm632_vm3, %v1176_v15, 0.0  ;;  %v1204_v46 = vadd.f32 %v1203_v44, %v1189_v40 }
 0x25f   : > { %v1047_v49 = vmul.f32 %v1542_v48, %v1538_v27  ;;  %v1196_v27 = vadd.f32 %v1195_v25, %v1194_v24  ;;  %v1544_v48 = vpop.eup %1543 }
 0x260   : > { %v1048_v50 = vpack.c.bf16 %v1046_v19, %v1046_v19  ;;  %v1217_v20 = vrot.slane %v1544_v48, %v1881_v26 }
 0x261   : > { %v1049_v51 = vpack.c.bf16 %v1047_v49, %v1047_v49  ;;  %v1197_v32 = vrot.slane %v1196_v27, 4  ;;  %v1546_v49 = vpop.eup %1545 }
 0x262   : > { %v1057_v52 = vsel %vm1055_vm12, %v1048_v50, 0  ;;  %v1206_v50 = vmul.f32 %v1204_v46, %v1883_v28 }
 0x263   : > { %1435 = vmatpush3.bf16.msra.mxu0 %v1057_v52  ;;  %v1103_v11 = vsel %vm1055_vm12, %v1049_v51, 0  ;;  %v1198_v36 = vadd.f32 %v1197_v32, %v1196_v27  ;;  %v1221_v52 = vrot.slane %v1546_v49, %v1881_v26 }
 0x264   : > { %1441 = vmatpush3.bf16.msra.mxu1 %v1103_v11 }
 0x265   : > { %v1199_v41 = vrot.slane %v1198_v36, 2 }
 0x266   : > { %1437 = vmatmul.mubr.msk.bf16.vlgmr.msra.gmra.mrb[8].mxu0 %vm632_vm3, %v1050_v53 }
 0x267   : > { %1443 = vmatmul.mubr.msk.bf16.vlgmr.msra.gmra.mrb[8].mxu1 %vm632_vm3, %v1051_v54  ;;  %v1200_v35 = vadd.f32 %v1199_v41, %v1198_v36 }
 0x269   : > { %v1201_v39 = vrot.slane %v1200_v35, 1 }
 0x26b   : > { %v1202_v45 = vadd.f32 %v1201_v39, %v1200_v35 }
 0x26d   : > { %v1205_v19 = vadd.f32 %v1203_v44, %v1202_v45 }
 0x26f   : > { %v1207_v51 = vmul.f32 %v1205_v19, %v1875_v22 }
 0x339   : > { %v1093_v59 = vpop.f32.mrb[8].mxu0 }
 0x33a   : > { %v1208_v53 = vmul.f32 %v1206_v50, %v1093_v59  ;;  %v1139_v11 = vpop.f32.mrb[8].mxu1  ;;  %v1438_v54 = vpop.f32.mrb[9].mxu0 }
 0x33b   : > { %v1209_v55 = vmul.f32 %v1207_v51, %v1139_v11  ;;  %v1096_v56 = vpop.f32.mrb[10].mxu0  ;;  %v1444_v57 = vpop.f32.mrb[9].mxu1 }
 0x33c   : > { %v1222_v58 = vmul.f32 %v1217_v20, %v1208_v53  ;;  %v1439_v28 = vpop.f32.mrb[11].mxu0  ;;  %v1142_v60 = vpop.f32.mrb[10].mxu1 }
 0x33d   : > { %v1223_v62 = vmul.f32 %v1221_v52, %v1209_v55  ;;  %v1445_v63 = vpop.f32.mrb[11].mxu1 }
 0x33e   : > { %v1236_v47 = vmul.f32 %v1389_v21, %v1222_v58 }
 0x33f   : > { %v1237_v1 = vmul.f32 %v1390_v61, %v1223_v62 }
 0x340   : > { %v1239_v22 = vsel %vm1238_vm13, %v1236_v47, 0.0 }
 0x341   : > { %v1242_v2 = vsel %vm1238_vm13, %v1237_v1, 0.0  ;;  %1240 = vadd.xlane.f32.xlu0 %v1239_v22 }
 0x342   : > { %1243 = vadd.xlane.f32.xlu1 %v1242_v2 }
 0x3ce   : > { %v1241_v26 = vpop.xlane.xlu0 %1240 }
 0x3cf   : > { %v1244_v0 = vpop.xlane.xlu1 %1243  ;;  %v1246_v6 = vmul.f32 0.125, %v1241_v26 }
 0x3d0   : > { %v1247_v7 = vmul.f32 0.125, %v1244_v0 }
 0x3d1   : > { %v1248_v31 = vsub.f32 %v1236_v47, %v1246_v6 }
 0x3d2   : > { %v1249_v8 = vsub.f32 %v1237_v1, %v1247_v7 }
 0x3d3   : > { %1250 = vst.msk [vmem:[%s349_s30] sm:$0x7] %vm1238_vm13, %v1248_v31 }
 0x3d4   : > { %1251 = vst.msk [vmem:[%s349_s30 + $0x4] sm:$0x7] %vm1238_vm13, %v1249_v8 }
 0x3d5 PF: > { %p17_p13 = scmp.ge.s32.totalorder %s1701_s26, 6   ;;  %s2046_s21 = smov %s1622_s22 }
 0x3d6   : > { %s2047_s22 = smov %s1626_s23  ;;  %s2048_s23 = smov %s1711_s29 }
 0x3d7   : > { %s2049_s24 = smov %s1701_s26  ;;  %19 = sbr.rel (!%p17_p13) target bundleno = 4 (0x4), region = 98 }
 0x3de   :  { %1274 = vsyncpa [#allocation3], 1 }
 0x3df   :  { %1276 = vsyncpa [#allocation3 + $0x1], 1 }
 0x3e0   :  { %1277 = vsyncpa [#allocation4], 1 }
 0x3e1   :  { %1279 = vsyncpa [#allocation4 + $0x1], 1 }

</bundles_post_ra>
